<compile_context>
chip_gen: v6e
topology: v6e:2x2x1
jax: 0.10.0
libtpu: 0.0.40
codegen_flags: <defaults>
</compile_context>

<pallas_src>
import jax
import jax.numpy as jnp
from jax import lax
from jax.experimental import pallas as pl
from jax.experimental.pallas import tpu as pltpu


def _make_triplet_kernel(margin: float, n: int):
    # Plain Python floats -> inlined literals (no captured scalar constants).
    margin = float(margin)
    inv_n = 1.0 / float(n)
    big = 1e30  # masked-out sentinel for negative mining; real dist^2 << 1e30

    def kernel(x_ref, tcol_ref, trow_ref, loss_ref, correct_ref):
        x = x_ref[...]                                            # (n, d), native dtype

        # Gram = x @ x.T on the MXU without materializing the transpose:
        # contract dim 1 of x with dim 1 of x, accumulate in f32.
        gram = lax.dot_general(
            x, x,
            dimension_numbers=(((1,), (1,)), ((), ())),
            preferred_element_type=jnp.float32,
        )                                                         # (n, n) f32

        # Squared norms straight from the Gram diagonal (no f32 copy of x, no
        # (n,1)->(1,n) transpose): lane reduce -> column norms, sublane reduce ->
        # row norms.
        row_ids = lax.broadcasted_iota(jnp.int32, (n, n), 0)
        col_ids = lax.broadcasted_iota(jnp.int32, (n, n), 1)
        diag = jnp.where(row_ids == col_ids, gram, 0.0)           # (n, n)
        sq_col = jnp.sum(diag, axis=1, keepdims=True)             # (n, 1)  ||x_i||^2
        sq_row = jnp.sum(diag, axis=0, keepdims=True)             # (1, n)  ||x_j||^2

        # Pairwise SQUARED distances, clamped before mining (sqrt is monotone, so
        # mining on dist^2 selects the same winners as mining on dist).
        dist2 = jnp.maximum(sq_col + sq_row - 2.0 * gram, 1e-12)  # (n, n) f32

        # Same-class mask via broadcast of (n,1) labels against (1,n) labels.
        mask = tcol_ref[...] == trow_ref[...]                     # (n, n) bool

        # Hard mining on squared distances; masked copies feed the reductions
        # directly (at most one masked (n,n) temporary live at a time).
        #  - hardest positive: 0.0 filler is safe (diagonal is always same-class,
        #    and clamped dist2 >= 1e-12 > 0).
        #  - hardest negative: +big filler matches the reference's +inf behavior.
        d2_ap = jnp.max(jnp.where(mask, dist2, 0.0), axis=1, keepdims=True)   # (n, 1)
        d2_an = jnp.min(jnp.where(mask, big, dist2), axis=1, keepdims=True)   # (n, 1)

        # Only 2n sqrt ops on the EUP (instead of n^2).
        dist_ap = jnp.sqrt(d2_ap)
        dist_an = jnp.sqrt(d2_an)

        # MarginRankingLoss with y = 1: mean(relu(margin - (dist_an - dist_ap)))
        per_sample = jnp.maximum(margin + dist_ap - dist_an, 0.0)             # (n, 1)

        # Scalar results -> SMEM (scalar path, no masked VMEM tile writeback).
        loss_ref[0] = jnp.sum(per_sample) * inv_n
        correct_ref[0] = jnp.sum((dist_an >= dist_ap).astype(jnp.float32))

    return kernel


def _vmem_limit_bytes(n: int, d: int, itemsize: int) -> int:
    # Live VMEM ~= double-buffered x tile + a handful of (n, n) f32 intermediates
    # (gram, diag mask, dist2, one masked copy) + headroom.  Clamp to the actual
    # chip's VMEM (64 MiB/TC on v7x, 128 MiB on v5e/v6e) with ~10% headroom.
    est = 2 * n * d * itemsize + 5 * n * n * 4 + (4 << 20)
    try:
        cap = pltpu.get_tpu_info().vmem_capacity_bytes
    except Exception:
        cap = 64 * 1024 * 1024  # conservative fallback (v7x per-TensorCore VMEM)
    return int(min(max(est, 16 * 1024 * 1024), int(cap * 0.9)))


def ori_triplet_loss(inputs, targets, margin=0.3):
    """inputs: (n, d) float32/bfloat16, targets: (n,) int labels. Returns (loss, correct)."""
    n, d = inputs.shape
    t_col = targets.reshape(n, 1).astype(jnp.int32)   # glue: label reshapes only
    t_row = targets.reshape(1, n).astype(jnp.int32)

    loss, correct = pl.pallas_call(
        _make_triplet_kernel(float(margin), n),
        out_shape=(
            jax.ShapeDtypeStruct((1,), jnp.float32),
            jax.ShapeDtypeStruct((1,), jnp.float32),
        ),
        in_specs=[
            pl.BlockSpec((n, d), lambda: (0, 0)),
            pl.BlockSpec((n, 1), lambda: (0, 0)),
            pl.BlockSpec((1, n), lambda: (0, 0)),
        ],
        out_specs=(
            pl.BlockSpec(memory_space=pltpu.SMEM),
            pl.BlockSpec(memory_space=pltpu.SMEM),
        ),
        compiler_params=pltpu.CompilerParams(
            vmem_limit_bytes=_vmem_limit_bytes(n, d, inputs.dtype.itemsize)),
    )(inputs, t_col, t_row)
    return loss[0], correct[0].astype(jnp.int32)


def _reference(inputs, targets, margin=0.3):
    # Pure-JAX reference mirroring the PyTorch forward (sanity check only).
    inputs = inputs.astype(jnp.float32)
    sq = jnp.sum(inputs ** 2, axis=1, keepdims=True)
    dist = sq + sq.T - 2.0 * inputs @ inputs.T
    dist = jnp.sqrt(jnp.maximum(dist, 1e-12))
    mask = targets[:, None] == targets[None, :]
    dist_ap = jnp.max(jnp.where(mask, dist, -jnp.inf), axis=1)
    dist_an = jnp.min(jnp.where(mask, jnp.inf, dist), axis=1)
    loss = jnp.mean(jnp.maximum(margin + dist_ap - dist_an, 0.0))
    correct = jnp.sum(dist_an >= dist_ap)
    return loss, correct


if __name__ == "__main__":
    key = jax.random.PRNGKey(0)
    batch, feat_dim = 8, 32
    x = jax.random.normal(key, (batch, feat_dim), dtype=jnp.float32)
    # Deterministic labels: 4 classes, 2 samples each (positives & negatives exist).
    targets = jnp.array([0, 0, 1, 1, 2, 2, 3, 3], dtype=jnp.int32)

    loss, correct = ori_triplet_loss(x, targets, margin=0.3)
    jax.block_until_ready((loss, correct))

    ref_loss, ref_correct = _reference(x, targets, margin=0.3)
    assert jnp.allclose(loss, ref_loss, atol=1e-5), (loss, ref_loss)
    assert int(correct) == int(ref_correct), (correct, ref_correct)

    print("KERNEL_OK")
</pallas_src>

<mosaic_0001>
module attributes {stable_mosaic.version = 11 : i64} {
  func.func @kernel(%arg0: memref<8x32xf32, #tpu.memory_space<vmem>>, %arg1: memref<8x1xi32, #tpu.memory_space<vmem>>, %arg2: memref<1x8xi32, #tpu.memory_space<vmem>>, %arg3: memref<1xf32, #tpu.memory_space<smem>>, %arg4: memref<1xf32, #tpu.memory_space<smem>>) attributes {dimension_semantics = [], scalar_prefetch = 0 : i64, scratch_operands = 0 : i64, tpu.core_type = #tpu.core_type<tc>} {
    %c0 = arith.constant 0 : index
    %c0_0 = arith.constant 0 : index
    %0 = vector.load %arg0[%c0, %c0_0] : memref<8x32xf32, #tpu.memory_space<vmem>>, vector<8x32xf32>
    %cst = arith.constant dense<0.000000e+00> : vector<8x8xf32>
    %1 = tpu.matmul %0, %0, %cst {dimension_numbers = #tpu.dot_dimension_numbers<[1], [1], [0], [0], [0, 0, 1, 0], [], []>} : vector<8x32xf32>, vector<8x32xf32>, vector<8x8xf32> -> vector<8x8xf32>
    %2 = tpu.iota {dimensions = array<i32: 0>} : vector<8x8xi32>
    %3 = tpu.iota {dimensions = array<i32: 1>} : vector<8x8xi32>
    %4 = arith.cmpi eq, %2, %3 : vector<8x8xi32>
    %cst_1 = arith.constant 0.000000e+00 : f32
    %5 = vector.broadcast %cst_1 : f32 to vector<8x8xf32>
    %6 = arith.select %4, %1, %5 : vector<8x8xi1>, vector<8x8xf32>
    %cst_2 = arith.constant dense<0.000000e+00> : vector<8xf32>
    %7 = vector.multi_reduction <add>, %6, %cst_2 [1] : vector<8x8xf32> to vector<8xf32>
    %8 = vector.shape_cast %7 : vector<8xf32> to vector<8x1xf32>
    %cst_3 = arith.constant dense<0.000000e+00> : vector<8xf32>
    %9 = vector.multi_reduction <add>, %6, %cst_3 [0] : vector<8x8xf32> to vector<8xf32>
    %10 = vector.shape_cast %9 : vector<8xf32> to vector<1x8xf32>
    %11 = vector.broadcast %8 : vector<8x1xf32> to vector<8x8xf32>
    %12 = vector.broadcast %10 : vector<1x8xf32> to vector<8x8xf32>
    %13 = arith.addf %11, %12 : vector<8x8xf32>
    %cst_4 = arith.constant 2.000000e+00 : f32
    %14 = vector.broadcast %cst_4 : f32 to vector<8x8xf32>
    %15 = arith.mulf %14, %1 : vector<8x8xf32>
    %16 = arith.subf %13, %15 : vector<8x8xf32>
    %cst_5 = arith.constant 9.99999996E-13 : f32
    %17 = vector.broadcast %cst_5 : f32 to vector<8x8xf32>
    %18 = arith.maximumf %16, %17 : vector<8x8xf32>
    %c0_6 = arith.constant 0 : index
    %c0_7 = arith.constant 0 : index
    %19 = vector.load %arg1[%c0_6, %c0_7] : memref<8x1xi32, #tpu.memory_space<vmem>>, vector<8x1xi32>
    %c0_8 = arith.constant 0 : index
    %c0_9 = arith.constant 0 : index
    %20 = vector.load %arg2[%c0_8, %c0_9] : memref<1x8xi32, #tpu.memory_space<vmem>>, vector<1x8xi32>
    %21 = vector.broadcast %19 : vector<8x1xi32> to vector<8x8xi32>
    %22 = vector.broadcast %20 : vector<1x8xi32> to vector<8x8xi32>
    %23 = arith.cmpi eq, %21, %22 : vector<8x8xi32>
    %cst_10 = arith.constant 0.000000e+00 : f32
    %24 = vector.broadcast %cst_10 : f32 to vector<8x8xf32>
    %25 = arith.select %23, %18, %24 : vector<8x8xi1>, vector<8x8xf32>
    %cst_11 = arith.constant dense<0xFF800000> : vector<8xf32>
    %26 = vector.multi_reduction <maximumf>, %25, %cst_11 [1] : vector<8x8xf32> to vector<8xf32>
    %27 = vector.shape_cast %26 : vector<8xf32> to vector<8x1xf32>
    %cst_12 = arith.constant 1.000000e+30 : f32
    %28 = vector.broadcast %cst_12 : f32 to vector<8x8xf32>
    %29 = arith.select %23, %28, %18 : vector<8x8xi1>, vector<8x8xf32>
    %cst_13 = arith.constant dense<0x7F800000> : vector<8xf32>
    %30 = vector.multi_reduction <minimumf>, %29, %cst_13 [1] : vector<8x8xf32> to vector<8xf32>
    %31 = vector.shape_cast %30 : vector<8xf32> to vector<8x1xf32>
    %32 = math.sqrt %27 : vector<8x1xf32>
    %33 = math.sqrt %31 : vector<8x1xf32>
    %cst_14 = arith.constant 3.000000e-01 : f32
    %34 = vector.broadcast %cst_14 : f32 to vector<8x1xf32>
    %35 = arith.addf %34, %32 : vector<8x1xf32>
    %36 = arith.subf %35, %33 : vector<8x1xf32>
    %cst_15 = arith.constant 0.000000e+00 : f32
    %37 = vector.broadcast %cst_15 : f32 to vector<8x1xf32>
    %38 = arith.maximumf %36, %37 : vector<8x1xf32>
    %39 = vector.shape_cast %38 : vector<8x1xf32> to vector<1x8x1xf32>
    %cst_16 = arith.constant dense<0.000000e+00> : vector<1xf32>
    %40 = vector.multi_reduction <add>, %39, %cst_16 [1, 2] : vector<1x8x1xf32> to vector<1xf32>
    %41 = vector.shape_cast %40 : vector<1xf32> to vector<1x1x1xf32>
    %42 = vector.extract %41[0, 0, 0] : f32 from vector<1x1x1xf32>
    %cst_17 = arith.constant 1.250000e-01 : f32
    %43 = arith.mulf %42, %cst_17 : f32
    %c0_18 = arith.constant 0 : index
    %44 = memref.load %arg3[%c0_18] : memref<1xf32, #tpu.memory_space<smem>>
    memref.store %43, %arg3[%c0_18] : memref<1xf32, #tpu.memory_space<smem>>
    %45 = arith.cmpf oge, %33, %32 : vector<8x1xf32>
    %46 = arith.extui %45 : vector<8x1xi1> to vector<8x1xi32>
    %47 = arith.sitofp %46 : vector<8x1xi32> to vector<8x1xf32>
    %48 = vector.shape_cast %47 : vector<8x1xf32> to vector<1x8x1xf32>
    %cst_19 = arith.constant dense<0.000000e+00> : vector<1xf32>
    %49 = vector.multi_reduction <add>, %48, %cst_19 [1, 2] : vector<1x8x1xf32> to vector<1xf32>
    %50 = vector.shape_cast %49 : vector<1xf32> to vector<1x1x1xf32>
    %51 = vector.extract %50[0, 0, 0] : f32 from vector<1x1x1xf32>
    %c0_20 = arith.constant 0 : index
    %52 = memref.load %arg4[%c0_20] : memref<1xf32, #tpu.memory_space<smem>>
    memref.store %51, %arg4[%c0_20] : memref<1xf32, #tpu.memory_space<smem>>
    return
  }
}

</mosaic_0001>

<bundles_post_ra>
// kernel: tpu_custom_call.1
= control target key start
LH: loop header
LB: loop body
LE: loop exit
PB: predicated region body
PF: predicated region fallthrough
CT: control target
= control target key end

     0   :  { %10 = vsyncpa [#allocation3], 0  ;;  %vm19_vm0 = vcmask 261120   ;;  %s298_s0 = inlined_call_operand.vmem [shape: f32[8,32], index: 0, kind: input, shape index: {}]   ;;  %s299_s1 = inlined_call_operand.vmem [shape: s32[8,1], index: 1, kind: input, shape index: {}]   ;;  %s300_s2 = inlined_call_operand.vmem [shape: s32[1,8], index: 2, kind: input, shape index: {}]   ;;  %s301_s3 = inlined_call_operand.hbm [shape: f32[1], index: 3, kind: output, shape index: {0}]   ;;  %s302_s4 = inlined_call_operand.hbm [shape: f32[1], index: 4, kind: output, shape index: {1}]  }
   0x1   :  { %v18_v0 = vld [vmem:[%s298_s0] sm:$0xff] }
   0x2   :  { %11 = vsyncpa [#allocation5], 0  ;;  %v247_v1 = vmov 0.0   ;;  %vm248_vm1 = vmmov 0   ;;  %v249_v2 = vmov 0   ;;  %v93_v3 = vlaneseq  ;;  %v113_v10 = vld [vmem:[%s299_s1] sm:$0xff] }
   0x3   :  { %208 = vmatprep.subr.mxu0 %v247_v1  ;;  %210 = vmatprep.mubr.msk.f32.mxu0 %vm248_vm1, %v247_v1  ;;  %vm99_vm3 = vcmask 64512   ;;  %v204_v21 = vld [vmem:[%s300_s2] ss:$0 sm:$0xff]  ;;  %vm148_vm10 = vcmask 7168   ;;  %s250_s21 = smov [#allocation2]   ;;  %s251_s24 = smov [#allocation4]  }
   0x4   :  { %209 = vmatpush3.xpose.msk.msra.mxu0 %vm19_vm0, %v18_v0  ;;  %222 = vset.pattern.permute.xlu0 %v249_v2  ;;  %v94_v4 = vshrl.u32 %v93_v3, 7  ;;  %v96_v5 = vand.u32 127, %v93_v3 }
   0x6   :  { %vm97_vm2 = vcmp.eq.s32.totalorder %v94_v4, %v96_v5 }
   0x7   :  { %211 = vmatmul.mubr.msk.f32.vlgmr.msra.gmra.mxu0 %vm19_vm0, %v18_v0 }
  0xc7   :  { %v89_v6 = vpop.f32.mrf.mxu0 }
  0xc8   :  { %v98_v7 = vsel %vm97_vm2, %v89_v6, 0.0  ;;  %v110_v18 = vmul.f32 2.0, %v89_v6 }
  0xc9   :  { %v212_v8 = vpop.f32.mrf.mxu0  ;;  %v100_v9 = vsel %vm99_vm3, %v98_v7, 0.0 }
  0xca   :  { %101 = vadd.xlane.f32.xlu0 %v100_v9  ;;  %v103_v11 = vrot.slane %v100_v9, 4 }
  0xcc   :  { %v104_v12 = vadd.f32 %v103_v11, %v100_v9 }
  0xce   :  { %v105_v13 = vrot.slane %v104_v12, 2 }
  0xd0   :  { %v106_v14 = vadd.f32 %v105_v13, %v104_v12 }
  0xd2   :  { %v107_v15 = vrot.slane %v106_v14, 1 }
  0xd4   :  { %v108_v16 = vadd.f32 %v107_v15, %v106_v14 }
  0xe0   :  { %116 = vperm.xlu0 %222, %v113_v10  }
 0x153   :  { %v102_v17 = vpop.xlane.xlu0 %101 }
 0x154   :  { %v109_v19 = vadd.f32 %v108_v16, %v102_v17 }
 0x156   :  { %v111_v20 = vsub.f32 %v109_v19, %v110_v18 }
 0x158   :  { %v112_v23 = vmax.f32 %v111_v20, 1e-12 }
 0x15b   :  { %v117_v22 = vpop.permute.xlu0 %116 }
 0x15c   :  { %vm122_vm4 = vcmp.eq.s32.totalorder %v117_v22, %v204_v21 }
 0x15d   :  { %v123_v24 = vsel %vm122_vm4, %v112_v23, 0.0  ;;  %v127_v26 = vsel %vm122_vm4, 1e+30, %v112_v23 }
 0x15e   :  { %v124_v25 = vsel %vm99_vm3, %v123_v24, -inf  ;;  %v128_v27 = vsel %vm99_vm3, %v127_v26, inf }
 0x15f   :  { %125 = vmax.xlane.f32.xlu1 %v124_v25 }
 0x163   :  { %129 = vmin.xlane.f32.xlu1 %v128_v27 }
 0x1e8   :  { %v126_v28 = vpop.xlane.xlu1 %125 }
 0x1e9   :  { %223 = vrsqrt.f32 %v126_v28  ;;  %vm133_vm5 = vcmp.eq.f32.partialorder %v126_v28, inf  ;;  %v136_v32 = vand.u32 2147483648, %v126_v28  ;;  %vm135_vm6 = vcmp.eq.f32.partialorder %v126_v28, 0.0 }
 0x1ec   :  { %v130_v29 = vpop.xlane.xlu1 %129 }
 0x1ed   :  { %225 = vrsqrt.f32 %v130_v29  ;;  %vm140_vm7 = vcmp.eq.f32.partialorder %v130_v29, inf  ;;  %v143_v37 = vand.u32 2147483648, %v130_v29  ;;  %vm142_vm8 = vcmp.eq.f32.partialorder %v130_v29, 0.0 }
 0x1f6   :  { %v224_v30 = vpop.eup %223 }
 0x1f7   :  { %v132_v31 = vmul.f32 %v224_v30, %v126_v28 }
 0x1f9   :  { %v134_v33 = vsel %vm133_vm5, %v126_v28, %v132_v31 }
 0x1fa   :  { %v226_v34 = vpop.eup %225  ;;  %v137_v35 = vsel %vm135_vm6, %v136_v32, %v134_v33 }
 0x1fb   :  { %v139_v36 = vmul.f32 %v226_v34, %v130_v29  ;;  %v145_v39 = vadd.f32 0.3, %v137_v35 }
 0x1fd   :  { %v141_v38 = vsel %vm140_vm7, %v130_v29, %v139_v36 }
 0x1fe   :  { %v144_v40 = vsel %vm142_vm8, %v143_v37, %v141_v38 }
 0x1ff   :  { %v146_v41 = vsub.f32 %v145_v39, %v144_v40  ;;  %vm162_vm9 = vcmp.ge.f32.partialorder %v144_v40, %v137_v35 }
 0x200   :  { %v205_v44 = vsel %vm162_vm9, 1.0, %v247_v1 }
 0x201   :  { %v147_v42 = vmax.f32 %v146_v41, 0.0  ;;  %v165_v45 = vsel %vm148_vm10, %v205_v44, 0.0 }
 0x203   :  { %v149_v43 = vsel %vm148_vm10, %v147_v42, 0.0 }
 0x204   :  { %150 = vadd.xlane.f32.xlu1 %v149_v43 }
 0x208   :  { %166 = vadd.xlane.f32.xlu1 %v165_v45 }
 0x28d   :  { %v151_v46 = vpop.xlane.xlu1 %150 }
 0x28e   :  { %v152_v47 = vrot.slane %v151_v46, 4 }
 0x290   :  { %v153_v48 = vadd.f32 %v152_v47, %v151_v46 }
 0x291   :  { %v167_v49 = vpop.xlane.xlu1 %166 }
 0x292   :  { %v154_v50 = vrot.slane %v153_v48, 2  ;;  %v168_v51 = vrot.slane %v167_v49, 4 }
 0x294   :  { %v169_v52 = vadd.f32 %v168_v51, %v167_v49  ;;  %v155_v53 = vadd.f32 %v154_v50, %v153_v48 }
 0x296   :  { %v170_v54 = vrot.slane %v169_v52, 2  ;;  %v156_v55 = vrot.slane %v155_v53, 1 }
 0x298   :  { %v171_v56 = vadd.f32 %v170_v54, %v169_v52  ;;  %v157_v57 = vadd.f32 %v156_v55, %v155_v53 }
 0x29a   :  { %213 = vpush %v157_v57  ;;  %v172_v58 = vrot.slane %v171_v56, 1 }
 0x29c   :  { %v173_v59 = vadd.f32 %v172_v58, %v171_v56 }
 0x29e   :  { %215 = vpush %v173_v59 }
 0x2cb   :  { %s214_s1 = spop %213 }
 0x2cc   :  { %s159_s2 = smul.f32 0.125, %s214_s1 }
 0x2ce   :  { %161 = sst [smem:[#allocation2]] %s159_s2 }
 0x2cf   :  { %s216_s20 = spop %215 }
 0x2d0   :  { %176 = sst [smem:[#allocation4]] %s216_s20 }
 0x2d1   :  { %184 = dma.smem_to_hbm %s250_s21, 16, %s301_s3, [#allocation3]  }
 0x2d2   :  { %192 = dma.smem_to_hbm %s251_s24, 16, %s302_s4, [#allocation5]  }
 0x2d3   :  { %243 = dma.done.wait [#allocation3], 16  }
 0x2d4   :  { %244 = vsyncadd [#allocation3], 4294967280 }
 0x2d5   :  { %245 = dma.done.wait [#allocation5], 16  }
 0x2d6   :  { %246 = vsyncadd [#allocation5], 4294967280 }
 0x2d7   :  { %199 = sfence }
 0x2d8   :  { %200 = vsyncpa [#allocation3], 1 }
 0x2d9   :  { %201 = vsyncpa [#allocation5], 1 }

</bundles_post_ra>
